<compile_context>
chip_gen: v5e
topology: v5e:2x2
jax: 0.10.0
libtpu: 0.0.40
codegen_flags: <defaults>
</compile_context>

<pallas_src>
import functools

import jax
import jax.numpy as jnp
from jax.experimental import pallas as pl
from jax.experimental.pallas import tpu as pltpu


def _discriminator_kernel(xin_ref,
                          w1x_ref, w1r0_ref, w1r1_ref, b1_ref,
                          w2_ref, b2_ref, w3row_ref, b3_ref,
                          out_ref, *, input_dim):
    xin = xin_ref[...]                         # (TB, input_dim + 4)
    d = input_dim
    x = xin[:, :d]                             # (TB, input_dim)
    t = xin[:, d:d + 1]                        # (TB, 1)
    y = xin[:, d + 1:d + 2]                    # (TB, 1)
    hy0 = xin[:, d + 2:d + 3]                  # (TB, 1)
    hy1 = xin[:, d + 3:d + 4]                  # (TB, 1)

    # Treatment / control mixing (elementwise, VPU, f32).
    input0 = (1.0 - t) * y + t * hy0           # (TB, 1)
    input1 = t * y + (1.0 - t) * hy1           # (TB, 1)

    # fc1 on the concatenated input.  Instead of materializing
    # concat([x, input0, input1]) we use the pre-split W1 rows; the result is
    # mathematically identical to Linear(concat(...)).
    pre1 = (jnp.dot(x, w1x_ref[...], preferred_element_type=jnp.float32)
            + input0 * w1r0_ref[...]           # (TB,1) * (1,h) broadcast
            + input1 * w1r1_ref[...]
            + b1_ref[...])
    h1 = jnp.maximum(pre1, 0.0)

    pre2 = jnp.dot(h1, w2_ref[...], preferred_element_type=jnp.float32) + b2_ref[...]
    h2 = jnp.maximum(pre2, 0.0)

    # fc3 (output width 1): VPU multiply + lane reduce instead of N=1 MXU matmul.
    out = jnp.sum(h2 * w3row_ref[...], axis=-1, keepdims=True) + b3_ref[...]
    out_ref[...] = out.astype(out_ref.dtype)


def _round_up(a, m):
    return (a + m - 1) // m * m


def prepare_params(params, input_dim):
    """One-time layout prep (hoisted out of the per-call hot path).

    Pre-splits W1 so the kernel never slices across weight sublane tiles, and
    reshapes the fc3 column / biases to (1, h) / (1, 1) row layouts.
    """
    w1, b1, w2, b2, w3, b3 = params
    h_dim = w1.shape[1]
    w1_x = w1[:input_dim, :]                      # (input_dim, h)
    w1_r0 = w1[input_dim:input_dim + 1, :]        # (1, h)
    w1_r1 = w1[input_dim + 1:input_dim + 2, :]    # (1, h)
    b1_2d = jnp.reshape(b1, (1, h_dim))
    b2_2d = jnp.reshape(b2, (1, h_dim))
    w3_row = jnp.reshape(w3, (1, h_dim))          # (1, h) (== w3.T for (h,1))
    b3_2d = jnp.reshape(b3, (1, 1))
    return (w1_x, w1_r0, w1_r1, b1_2d, w2, b2_2d, w3_row, b3_2d)


def _choose_tile(B, block_b):
    tb = _round_up(min(block_b, B), 8)
    # Keep >= 2 grid steps for larger batches so the "parallel" batch axis can
    # shard across both TensorCores on v7x; costs one extra (cheap) grid step
    # on single-TC v5e/v6e.
    if B >= 1024:
        tb = min(tb, _round_up(pl.cdiv(B, 2), 8))
    return tb


def discriminator_forward(x, t, y, hat_y, prepared_params, *, block_b=2048):
    B, input_dim = x.shape
    w1_x, w1_r0, w1_r1, b1, w2, b2, w3_row, b3 = prepared_params
    h_dim = w1_x.shape[1]
    feat = input_dim + 4

    # Single lane-contiguous input stream: [x | t | y | hat_y0 | hat_y1].
    xin = jnp.concatenate(
        [x, t, y, hat_y], axis=1).astype(jnp.float32)           # (B, feat)

    tb = _choose_tile(B, block_b)
    grid = (pl.cdiv(B, tb),)   # no host-side padding; last tile may be ragged

    cost = pl.CostEstimate(
        flops=int(2 * B * ((input_dim + 2) * h_dim + h_dim * h_dim + h_dim)),
        transcendentals=0,
        bytes_accessed=int(4 * (B * (feat + 1)
                                + (input_dim + 2) * h_dim
                                + h_dim * h_dim + 3 * h_dim + 1)),
    )

    resident = lambda shape: pl.BlockSpec(shape, lambda i: (0, 0))

    out = pl.pallas_call(
        functools.partial(_discriminator_kernel, input_dim=input_dim),
        out_shape=jax.ShapeDtypeStruct((B, 1), jnp.float32),
        grid=grid,
        in_specs=[
            pl.BlockSpec((tb, feat), lambda i: (i, 0)),        # merged input tile
            resident((input_dim, h_dim)),                      # w1_x
            resident((1, h_dim)),                              # w1_row0
            resident((1, h_dim)),                              # w1_row1
            resident((1, h_dim)),                              # b1
            resident((h_dim, h_dim)),                          # w2
            resident((1, h_dim)),                              # b2
            resident((1, h_dim)),                              # w3_row
            resident((1, 1)),                                  # b3
        ],
        out_specs=pl.BlockSpec((tb, 1), lambda i: (i, 0)),
        compiler_params=pltpu.CompilerParams(
            dimension_semantics=("parallel",)),
        cost_estimate=cost,
    )(xin, w1_x, w1_r0, w1_r1, b1, w2, b2, w3_row, b3)

    return out


def init_params(key, input_dim, h_dim):
    """Xavier-normal weights (zero biases), matching nn.init.xavier_normal_ /
    bias.zero_().  Weights stored as [in, out] (transposed vs. PyTorch)."""
    def xavier(k, fan_in, fan_out):
        std = jnp.sqrt(2.0 / (fan_in + fan_out))
        return jax.random.normal(k, (fan_in, fan_out), dtype=jnp.float32) * std

    k1, k2, k3 = jax.random.split(key, 3)
    w1 = xavier(k1, input_dim + 2, h_dim)
    b1 = jnp.zeros((1, h_dim), jnp.float32)
    w2 = xavier(k2, h_dim, h_dim)
    b2 = jnp.zeros((1, h_dim), jnp.float32)
    w3 = xavier(k3, h_dim, 1)
    b3 = jnp.zeros((1, 1), jnp.float32)
    return (w1, b1, w2, b2, w3, b3)


def reference_forward(x, t, y, hat_y, params):
    """Plain-JAX reference mirroring the PyTorch forward exactly."""
    w1, b1, w2, b2, w3, b3 = params
    input0 = (1.0 - t) * y + t * hat_y[:, 0:1]
    input1 = t * y + (1.0 - t) * hat_y[:, 1:2]
    inputs = jnp.concatenate([x, input0, input1], axis=1)
    h1 = jax.nn.relu(inputs @ w1 + b1)
    h2 = jax.nn.relu(h1 @ w2 + b2)
    return h2 @ w3 + b3


if __name__ == "__main__":
    input_dim, h_dim = 6, 32
    key = jax.random.PRNGKey(0)
    kp, kdata = jax.random.split(key)
    params = init_params(kp, input_dim, h_dim)
    prepared = prepare_params(params, input_dim)   # one-time layout prep

    ok = True
    # (B, block_b) cases: single tile, ragged single tile (B % 8 != 0), and a
    # multi-step grid with a ragged last tile (exercises the no-pad edge path).
    for B, blk in ((8, 2048), (13, 2048), (300, 128)):
        kx, kt, ky, kh, kdata = jax.random.split(kdata, 5)
        x = jax.random.normal(kx, (B, input_dim), dtype=jnp.float32)
        t = jax.random.bernoulli(kt, 0.5, (B, 1)).astype(jnp.float32)
        y = jax.random.normal(ky, (B, 1), dtype=jnp.float32)
        hat_y = jax.random.normal(kh, (B, 2), dtype=jnp.float32)

        out = discriminator_forward(x, t, y, hat_y, prepared, block_b=blk)
        out = jax.block_until_ready(out)

        ref = reference_forward(x, t, y, hat_y, params)
        ok &= out.shape == (B, 1)
        ok &= bool(jnp.allclose(out, ref, atol=1e-5, rtol=1e-5))

    assert ok
    print("KERNEL_OK")
</pallas_src>

<mosaic_0001>
module attributes {stable_mosaic.version = 11 : i64} {
  func.func @_discriminator_kernel(%arg0: i32, %arg1: memref<8x10xf32, #tpu.memory_space<vmem>>, %arg2: memref<6x32xf32, #tpu.memory_space<vmem>>, %arg3: memref<1x32xf32, #tpu.memory_space<vmem>>, %arg4: memref<1x32xf32, #tpu.memory_space<vmem>>, %arg5: memref<1x32xf32, #tpu.memory_space<vmem>>, %arg6: memref<32x32xf32, #tpu.memory_space<vmem>>, %arg7: memref<1x32xf32, #tpu.memory_space<vmem>>, %arg8: memref<1x32xf32, #tpu.memory_space<vmem>>, %arg9: memref<1x1xf32, #tpu.memory_space<vmem>>, %arg10: memref<8x1xf32, #tpu.memory_space<vmem>>) attributes {dimension_semantics = [#tpu.dimension_semantics<parallel>], iteration_bounds = array<i64: 1>, scalar_prefetch = 0 : i64, scratch_operands = 0 : i64, tpu.core_type = #tpu.core_type<tc>, window_params = [{transform_indices = @transform_0, window_bounds = array<i64: 8, 10>}, {pipeline_mode = #tpu.pipeline_mode<synchronous>, transform_indices = @transform_1, window_bounds = array<i64: 6, 32>}, {pipeline_mode = #tpu.pipeline_mode<synchronous>, transform_indices = @transform_2, window_bounds = array<i64: 1, 32>}, {pipeline_mode = #tpu.pipeline_mode<synchronous>, transform_indices = @transform_3, window_bounds = array<i64: 1, 32>}, {pipeline_mode = #tpu.pipeline_mode<synchronous>, transform_indices = @transform_4, window_bounds = array<i64: 1, 32>}, {pipeline_mode = #tpu.pipeline_mode<synchronous>, transform_indices = @transform_5, window_bounds = array<i64: 32, 32>}, {pipeline_mode = #tpu.pipeline_mode<synchronous>, transform_indices = @transform_6, window_bounds = array<i64: 1, 32>}, {pipeline_mode = #tpu.pipeline_mode<synchronous>, transform_indices = @transform_7, window_bounds = array<i64: 1, 32>}, {pipeline_mode = #tpu.pipeline_mode<synchronous>, transform_indices = @transform_8, window_bounds = array<i64: 1, 1>}, {transform_indices = @transform_9, window_bounds = array<i64: 8, 1>}]} {
    %c0 = arith.constant 0 : index
    %c0_0 = arith.constant 0 : index
    %0 = vector.load %arg1[%c0, %c0_0] : memref<8x10xf32, #tpu.memory_space<vmem>>, vector<8x10xf32>
    %1 = vector.extract_strided_slice %0 {offsets = [0, 0], sizes = [8, 6], strides = [1, 1]} : vector<8x10xf32> to vector<8x6xf32>
    %2 = vector.extract_strided_slice %0 {offsets = [0, 6], sizes = [8, 1], strides = [1, 1]} : vector<8x10xf32> to vector<8x1xf32>
    %3 = vector.extract_strided_slice %0 {offsets = [0, 7], sizes = [8, 1], strides = [1, 1]} : vector<8x10xf32> to vector<8x1xf32>
    %4 = vector.extract_strided_slice %0 {offsets = [0, 8], sizes = [8, 1], strides = [1, 1]} : vector<8x10xf32> to vector<8x1xf32>
    %5 = vector.extract_strided_slice %0 {offsets = [0, 9], sizes = [8, 1], strides = [1, 1]} : vector<8x10xf32> to vector<8x1xf32>
    %cst = arith.constant 1.000000e+00 : f32
    %6 = vector.broadcast %cst : f32 to vector<8x1xf32>
    %7 = arith.subf %6, %2 : vector<8x1xf32>
    %8 = arith.mulf %7, %3 : vector<8x1xf32>
    %9 = arith.mulf %2, %4 : vector<8x1xf32>
    %10 = arith.addf %8, %9 : vector<8x1xf32>
    %11 = arith.mulf %2, %3 : vector<8x1xf32>
    %cst_1 = arith.constant 1.000000e+00 : f32
    %12 = vector.broadcast %cst_1 : f32 to vector<8x1xf32>
    %13 = arith.subf %12, %2 : vector<8x1xf32>
    %14 = arith.mulf %13, %5 : vector<8x1xf32>
    %15 = arith.addf %11, %14 : vector<8x1xf32>
    %c0_2 = arith.constant 0 : index
    %c0_3 = arith.constant 0 : index
    %16 = vector.load %arg2[%c0_2, %c0_3] : memref<6x32xf32, #tpu.memory_space<vmem>>, vector<6x32xf32>
    %cst_4 = arith.constant dense<0.000000e+00> : vector<8x32xf32>
    %17 = tpu.matmul %1, %16, %cst_4 {dimension_numbers = #tpu.dot_dimension_numbers<[1], [0], [0], [1], [0, 0, 1, 1], [], []>} : vector<8x6xf32>, vector<6x32xf32>, vector<8x32xf32> -> vector<8x32xf32>
    %c0_5 = arith.constant 0 : index
    %c0_6 = arith.constant 0 : index
    %18 = vector.load %arg3[%c0_5, %c0_6] : memref<1x32xf32, #tpu.memory_space<vmem>>, vector<1x32xf32>
    %19 = vector.broadcast %10 : vector<8x1xf32> to vector<8x32xf32>
    %20 = vector.broadcast %18 : vector<1x32xf32> to vector<8x32xf32>
    %21 = arith.mulf %19, %20 : vector<8x32xf32>
    %22 = arith.addf %17, %21 : vector<8x32xf32>
    %c0_7 = arith.constant 0 : index
    %c0_8 = arith.constant 0 : index
    %23 = vector.load %arg4[%c0_7, %c0_8] : memref<1x32xf32, #tpu.memory_space<vmem>>, vector<1x32xf32>
    %24 = vector.broadcast %15 : vector<8x1xf32> to vector<8x32xf32>
    %25 = vector.broadcast %23 : vector<1x32xf32> to vector<8x32xf32>
    %26 = arith.mulf %24, %25 : vector<8x32xf32>
    %27 = arith.addf %22, %26 : vector<8x32xf32>
    %c0_9 = arith.constant 0 : index
    %c0_10 = arith.constant 0 : index
    %28 = vector.load %arg5[%c0_9, %c0_10] : memref<1x32xf32, #tpu.memory_space<vmem>>, vector<1x32xf32>
    %29 = vector.broadcast %28 : vector<1x32xf32> to vector<8x32xf32>
    %30 = arith.addf %27, %29 : vector<8x32xf32>
    %cst_11 = arith.constant 0.000000e+00 : f32
    %31 = vector.broadcast %cst_11 : f32 to vector<8x32xf32>
    %32 = arith.maximumf %30, %31 : vector<8x32xf32>
    %c0_12 = arith.constant 0 : index
    %c0_13 = arith.constant 0 : index
    %33 = vector.load %arg6[%c0_12, %c0_13] : memref<32x32xf32, #tpu.memory_space<vmem>>, vector<32x32xf32>
    %cst_14 = arith.constant dense<0.000000e+00> : vector<8x32xf32>
    %34 = tpu.matmul %32, %33, %cst_14 {dimension_numbers = #tpu.dot_dimension_numbers<[1], [0], [0], [1], [0, 0, 1, 1], [], []>} : vector<8x32xf32>, vector<32x32xf32>, vector<8x32xf32> -> vector<8x32xf32>
    %c0_15 = arith.constant 0 : index
    %c0_16 = arith.constant 0 : index
    %35 = vector.load %arg7[%c0_15, %c0_16] : memref<1x32xf32, #tpu.memory_space<vmem>>, vector<1x32xf32>
    %36 = vector.broadcast %35 : vector<1x32xf32> to vector<8x32xf32>
    %37 = arith.addf %34, %36 : vector<8x32xf32>
    %cst_17 = arith.constant 0.000000e+00 : f32
    %38 = vector.broadcast %cst_17 : f32 to vector<8x32xf32>
    %39 = arith.maximumf %37, %38 : vector<8x32xf32>
    %c0_18 = arith.constant 0 : index
    %c0_19 = arith.constant 0 : index
    %40 = vector.load %arg8[%c0_18, %c0_19] : memref<1x32xf32, #tpu.memory_space<vmem>>, vector<1x32xf32>
    %41 = vector.broadcast %40 : vector<1x32xf32> to vector<8x32xf32>
    %42 = arith.mulf %39, %41 : vector<8x32xf32>
    %cst_20 = arith.constant dense<0.000000e+00> : vector<8xf32>
    %43 = vector.multi_reduction <add>, %42, %cst_20 [1] : vector<8x32xf32> to vector<8xf32>
    %44 = vector.shape_cast %43 : vector<8xf32> to vector<8x1xf32>
    %c0_21 = arith.constant 0 : index
    %c0_22 = arith.constant 0 : index
    %45 = vector.load %arg9[%c0_21, %c0_22] : memref<1x1xf32, #tpu.memory_space<vmem>>, vector<1x1xf32>
    %46 = vector.broadcast %45 : vector<1x1xf32> to vector<8x1xf32>
    %47 = arith.addf %44, %46 : vector<8x1xf32>
    %c0_23 = arith.constant 0 : index
    %c0_24 = arith.constant 0 : index
    %48 = vector.load %arg10[%c0_23, %c0_24] : memref<8x1xf32, #tpu.memory_space<vmem>>, vector<8x1xf32>
    tpu.vector_store %arg10[%c0_23, %c0_24], %47 {strides = array<i32>} : memref<8x1xf32, #tpu.memory_space<vmem>>, vector<8x1xf32>,
    return
  }
  func.func @transform_0(%arg0: i32) -> (i32, i32) {
    %c0_i32 = arith.constant 0 : i32
    %c0_i32_0 = arith.constant 0 : i32
    return %arg0, %c0_i32 : i32, i32
  }
  func.func @transform_1(%arg0: i32) -> (i32, i32) {
    %c0_i32 = arith.constant 0 : i32
    %c0_i32_0 = arith.constant 0 : i32
    %c0_i32_1 = arith.constant 0 : i32
    return %c0_i32, %c0_i32_0 : i32, i32
  }
  func.func @transform_2(%arg0: i32) -> (i32, i32) {
    %c0_i32 = arith.constant 0 : i32
    %c0_i32_0 = arith.constant 0 : i32
    %c0_i32_1 = arith.constant 0 : i32
    return %c0_i32, %c0_i32_0 : i32, i32
  }
  func.func @transform_3(%arg0: i32) -> (i32, i32) {
    %c0_i32 = arith.constant 0 : i32
    %c0_i32_0 = arith.constant 0 : i32
    %c0_i32_1 = arith.constant 0 : i32
    return %c0_i32, %c0_i32_0 : i32, i32
  }
  func.func @transform_4(%arg0: i32) -> (i32, i32) {
    %c0_i32 = arith.constant 0 : i32
    %c0_i32_0 = arith.constant 0 : i32
    %c0_i32_1 = arith.constant 0 : i32
    return %c0_i32, %c0_i32_0 : i32, i32
  }
  func.func @transform_5(%arg0: i32) -> (i32, i32) {
    %c0_i32 = arith.constant 0 : i32
    %c0_i32_0 = arith.constant 0 : i32
    %c0_i32_1 = arith.constant 0 : i32
    return %c0_i32, %c0_i32_0 : i32, i32
  }
  func.func @transform_6(%arg0: i32) -> (i32, i32) {
    %c0_i32 = arith.constant 0 : i32
    %c0_i32_0 = arith.constant 0 : i32
    %c0_i32_1 = arith.constant 0 : i32
    return %c0_i32, %c0_i32_0 : i32, i32
  }
  func.func @transform_7(%arg0: i32) -> (i32, i32) {
    %c0_i32 = arith.constant 0 : i32
    %c0_i32_0 = arith.constant 0 : i32
    %c0_i32_1 = arith.constant 0 : i32
    return %c0_i32, %c0_i32_0 : i32, i32
  }
  func.func @transform_8(%arg0: i32) -> (i32, i32) {
    %c0_i32 = arith.constant 0 : i32
    %c0_i32_0 = arith.constant 0 : i32
    %c0_i32_1 = arith.constant 0 : i32
    return %c0_i32, %c0_i32_0 : i32, i32
  }
  func.func @transform_9(%arg0: i32) -> (i32, i32) {
    %c0_i32 = arith.constant 0 : i32
    %c0_i32_0 = arith.constant 0 : i32
    return %arg0, %c0_i32 : i32, i32
  }
}

</mosaic_0001>

<bundles_post_ra>
// kernel: tpu_custom_call.1
= control target key start
LH: loop header
LB: loop body
LE: loop exit
PB: predicated region body
PF: predicated region fallthrough
CT: control target
= control target key end

     0   :  { %s390_s0 = inlined_call_operand.hbm [shape: f32[8,10], index: 0, kind: input, shape index: {}]   ;;  %s391_s1 = inlined_call_operand.hbm [shape: f32[6,32], index: 1, kind: input, shape index: {}]   ;;  %s392_s2 = inlined_call_operand.vmem [shape: f32[1,32], index: 2, kind: input, shape index: {}]   ;;  %s393_s3 = inlined_call_operand.vmem [shape: f32[1,32], index: 3, kind: input, shape index: {}]   ;;  %s394_s4 = inlined_call_operand.vmem [shape: f32[1,32], index: 4, kind: input, shape index: {}]   ;;  %s395_s5 = inlined_call_operand.hbm [shape: f32[32,32], index: 5, kind: input, shape index: {}]   ;;  %s396_s6 = inlined_call_operand.vmem [shape: f32[1,32], index: 6, kind: input, shape index: {}]   ;;  %s397_s7 = inlined_call_operand.vmem [shape: f32[1,32], index: 7, kind: input, shape index: {}]   ;;  %s398_s8 = inlined_call_operand.<no memory space> [shape: f32[1,1], index: 8, kind: input, shape index: {}]   ;;  %s399_s9 = inlined_call_operand.vmem [shape: f32[8,1], index: 9, kind: output, shape index: {}]  }
   0x1   :  { %v14_v0 = vstv %s398_s8 }
   0x2   :  { %15 = vst [vmem:[#allocation2] sm:$0x1] %v14_v0 }
   0x3   :  { %16 = vsyncpa [#allocation4], 0 }
   0x4   :  { %17 = vsyncpa [#allocation6], 0  ;;  %s34_s13 = sshll.u32 %s391_s1, 4  ;;  %s301_s14 = smov [#allocation5]   ;;  %s35_s13 = int_to_ptr.hbm [resolvable:$true] %s34_s13 }
   0x5   :  { %s36_s15 = sshll.u32 %s301_s14, 4  ;;  %s23_s18 = sshll.u32 %s390_s0, 4  ;;  %s37_s15 = int_to_ptr.vmem [resolvable:$true] %s36_s15  ;;  %s24_s18 = int_to_ptr.hbm [resolvable:$true] %s23_s18 }
   0x6   :  { %39 = dma.hbm_to_vmem [thread:$0]  %s35_s13, 128, %s37_s15, [#allocation6]  }
   0x7   :  { %s302_s19 = smov [#allocation3]   ;;  %s50_s22 = sshll.u32 %s395_s5, 4  ;;  %s51_s22 = int_to_ptr.hbm [resolvable:$true] %s50_s22 }
   0x8   :  { %s25_s20 = sshll.u32 %s302_s19, 4  ;;  %s303_s1 = smov [#allocation7]   ;;  %s26_s20 = int_to_ptr.vmem [resolvable:$true] %s25_s20 }
   0x9   :  { %28 = dma.hbm_to_vmem [thread:$0]  %s24_s18, 128, %s26_s20, [#allocation4]  }
   0xa   :  { %s52_s23 = sshll.u32 %s303_s1, 4  ;;  %s304_s24 = smov 128   ;;  %s53_s23 = int_to_ptr.vmem [resolvable:$true] %s52_s23 }
   0xb   :  { %s305_s25 = smov 8  }
   0xc   :  { %58 = dma.hbm_to_vmem [thread:$0]  %s51_s22, 512, %s53_s23, [#allocation6], %s304_s24, %s304_s24, %s305_s25  }
   0xd   :  { %297 = dma.done.wait [#allocation4], 128  }
   0xe   :  { %298 = vsyncadd [#allocation4], 4294967168 }
   0xf   :  { %299 = dma.done.wait [#allocation6], 640  }
  0x10   :  { %300 = vsyncadd [#allocation6], 4294966656  ;;  %v77_v1 = vld [vmem:[#allocation3] sm:$0xff]  ;;  %s306_s0 = smov 125   ;;  %s307_s26 = smov 127   ;;  %vm109_vm0 = vcmask 1045504  }
  0x11   :  { %90 = vrot.lane.b32.xlu1 %v77_v1, %s306_s0  ;;  %80 = vrot.lane.b32.xlu0 %v77_v1, %s307_s26  ;;  %s308_s27 = smov 126   ;;  %v95_v2 = vld [vmem:[#allocation5] sm:$0x3f]  ;;  %vm106_vm1 = vcmask 48128   ;;  %v309_v3 = vmov 6   ;;  %v78_v4 = vsub.f32 1.0, %v77_v1 }
  0x12   :  { %204 = vmatpush.msk.msra.mxu0 %vm109_vm0, %v95_v2  ;;  %217 = vset.pattern.permute.xlu2 %v309_v3  ;;  %v153_v14 = vld [vmem:[#allocation7 + $0x18] sm:$0xff]  ;;  %v152_v15 = vld [vmem:[#allocation7 + $0x10] sm:$0xff]  ;;  %v151_v16 = vld [vmem:[#allocation7 + $0x8] sm:$0xff]  ;;  %vm158_vm2 = vcmask 261120   ;;  %vm196_vm3 = vcmask 7168  }
  0x13   :  { %205 = vmatmul.msk.f32.vlgmr.msra.gmra.mxu0 %vm106_vm1, %v77_v1  ;;  %216 = vset.pattern.permute.xlu1 %v309_v3  ;;  %v150_v17 = vld [vmem:[#allocation7] sm:$0xff]  ;;  %v220_v18 = vld [vmem:[%s392_s2] ss:$0 sm:$0xff] }
  0x14   :  { %218 = vset.pattern.permute.xlu0 %v309_v3  ;;  %174 = vmatpush.msra.mxu1 %v153_v14  ;;  %v219_v19 = vld [vmem:[%s393_s3] ss:$0 sm:$0xff] }
  0x15   :  { %v221_v26 = vld [vmem:[%s394_s4] ss:$0 sm:$0xff] }
  0x16   :  { %175 = vmatpush.msra.mxu1 %v152_v15  ;;  %v222_v30 = vld [vmem:[%s396_s6] ss:$0 sm:$0xff] }
  0x17   :  { %v223_v33 = vld [vmem:[%s397_s7] ss:$0 sm:$0xff] }
  0x18   :  { %176 = vmatpush.msra.mxu1 %v151_v16  ;;  %v224_v37 = vld [vmem:[#allocation2] ss:$0 sm:$0xff] }
  0x19   :  { %84 = vrot.lane.b32.xlu0 %v77_v1, %s308_s27 }
  0x1a   :  { %177 = vmatpush.msra.mxu1 %v150_v17 }
  0x83   :  { %v91_v5 = vpop.permute.xlu1 %90  ;;  %v81_v6 = vpop.permute.xlu0 %80 }
  0x84   :  { %v93_v7 = vmul.f32 %v91_v5, %v78_v4  ;;  %v89_v8 = vmul.f32 %v81_v6, %v77_v1  ;;  %v83_v11 = vmul.f32 %v81_v6, %v78_v4 }
  0x86   :  { %v94_v9 = vadd.f32 %v93_v7, %v89_v8 }
  0x88   :  { %136 = vperm.xlu2 %217, %v94_v9  }
  0x8b   :  { %v85_v10 = vpop.permute.xlu0 %84 }
  0x8c   :  { %v87_v12 = vmul.f32 %v85_v10, %v77_v1 }
  0x8e   :  { %v88_v13 = vadd.f32 %v87_v12, %v83_v11 }
  0x90   :  { %99 = vperm.xlu1 %216, %v88_v13   ;;  %v130_v22 = vpop.f32.mrf.mxu0 }
  0xe2   :  { %v137_v20 = vpop.permute.xlu2 %136 }
  0xe3   :  { %v142_v24 = vmul.f32 %v219_v19, %v137_v20 }
 0x102   :  { %v100_v21 = vpop.permute.xlu1 %99 }
 0x103   :  { %v105_v23 = vmul.f32 %v220_v18, %v100_v21 }
 0x105   :  { %v131_v25 = vadd.f32 %v130_v22, %v105_v23 }
 0x107   :  { %v143_v27 = vadd.f32 %v142_v24, %v131_v25 }
 0x109   :  { %v148_v28 = vadd.f32 %v221_v26, %v143_v27 }
 0x10b   :  { %v149_v29 = vmax.f32 %v148_v28, 0.0 }
 0x10d   :  { %206 = vmatmul.msk.f32.vlgmr.msra.gmra.mxu1 %vm158_vm2, %v149_v29 }
 0x18a   :  { %v179_v31 = vpop.f32.mrf.mxu1 }
 0x18b   :  { %v180_v32 = vadd.f32 %v222_v30, %v179_v31 }
 0x18d   :  { %v182_v34 = vmax.f32 %v180_v32, 0.0 }
 0x18f   :  { %v187_v35 = vmul.f32 %v223_v33, %v182_v34 }
 0x191   :  { %v188_v36 = vsel %vm158_vm2, %v187_v35, 0.0 }
 0x192   :  { %189 = vadd.xlane.f32.xlu2 %v188_v36 }
 0x205   :  { %v190_v38 = vpop.xlane.xlu2 %189 }
 0x206   :  { %v195_v39 = vadd.f32 %v224_v37, %v190_v38 }
 0x208   :  { %197 = vst.msk [vmem:[%s399_s9] sm:$0xff] %vm196_vm3, %v195_v39 }
 0x209   :  { %202 = vsyncpa [#allocation4], 1 }
 0x20a   :  { %203 = vsyncpa [#allocation6], 1 }

</bundles_post_ra>
